<compile_context>
chip_gen: v6e
topology: v6e:2x2x1
jax: 0.10.0
libtpu: 0.0.40
codegen_flags: <defaults>
</compile_context>

<pallas_src>
import functools

import jax
import jax.numpy as jnp
from jax import lax
from jax.experimental import pallas as pl
from jax.experimental.pallas import tpu as pltpu


# --------------------------------------------------------------------------- #
# Kernel
# --------------------------------------------------------------------------- #
def _margin_loss_kernel(score_l_ref, score_k_ref, bias_ref, weight_ref, out_ref,
                        *, b_true, tb):
    """One (batch-tile, k-block) tile of the pairwise hinge loss.

    contribution[k, l, b] = weight[k,l] * max(0, s[b,l] - s[b,k] + bias[k,l])
      bias[k,l]   = margin*(l-k)        on the band 1 <= l-k <= N-2, else -inf
      weight[k,l] = 1 / (B * (N-(l-k))) on the band, else 0
    Summing over all (k,l,b) reproduces sum_i mean(max(0, neg_i - pos_i + m*i)).
    """
    bi = pl.program_id(0)

    # Lane-dense scores: batch on lanes, score index on sublanes.
    s_l = score_l_ref[...]                       # (n_pad, tb)  all "neg" rows
    s_k = score_k_ref[...]                       # (tk,   tb)  this tile's "pos" rows

    # Single explicit relayouts, hoisted before the fused elementwise chain
    # (XLU work, overlaps the VALU-bound inner loop).
    s_k_col = s_k[:, None, :]                    # (tk, 1, tb)
    bias = bias_ref[...][:, :, None]             # (tk, n_pad, 1)
    wgt = weight_ref[...][:, :, None]            # (tk, n_pad, 1)

    # 4 VALU ops per pair element: sub, add, max, mul.  No selects, no masks.
    diff = s_l[None, :, :] - s_k_col             # (tk, n_pad, tb)
    hinge = jnp.maximum(diff + bias, 0.0)
    contrib = hinge * wgt

    # Reduce pair axes first (vreg adds + one sublane reduce), then mask only
    # the cheap per-batch (1, tb) vector -- padded batch lanes contribute 0.
    per_batch = jnp.sum(jnp.sum(contrib, axis=0), axis=0, keepdims=True)  # (1, tb)
    col = bi * tb + lax.broadcasted_iota(jnp.int32, (1, tb), 1)
    masked = jnp.where(col < b_true, per_batch, 0.0)

    out_ref[...] = jnp.full((1, 1, 1), jnp.sum(masked), dtype=jnp.float32)


# --------------------------------------------------------------------------- #
# Tiling / wrapper
# --------------------------------------------------------------------------- #
def _round_up(x, m):
    return -(-x // m) * m


def _vmem_capacity_bytes():
    try:
        info = pltpu.get_tpu_info()
        cap = getattr(info, "vmem_capacity_bytes", None)
        if cap:
            return int(cap)
    except Exception:
        pass
    return 128 << 20  # v5e/v6e-sized fallback


def _choose_tiles(b, n):
    """Pick (tb, tk, b_pad, n_pad, vmem_limit) per TPU generation.

    tb: batch lanes per tile (multiple of 128, lane-dense).
    tk: pair-row ("pos"/k) tile (multiple of 8) so the (tk, n_pad, tb) f32
        pairwise tensor plus 2-3 compiler temporaries stays inside VMEM.
    """
    vmem_cap = _vmem_capacity_bytes()
    if vmem_cap <= (64 << 20):        # v7x-class: 64 MiB VMEM/TC, 2 TensorCores
        pair_budget = 4 << 20
        vmem_limit = 48 << 20
        two_cores = True
    else:                             # v5e / v6e: 128 MiB VMEM, single TC
        pair_budget = 8 << 20
        vmem_limit = 64 << 20
        two_cores = False

    # Batch tile: lane-dense, capped; split so v7x gets >= 2 "parallel" tiles.
    b_pad = _round_up(max(b, 1), 128)
    tb = min(b_pad, 512)
    if two_cores and b_pad >= 256:
        tb = min(tb, _round_up(b_pad // 2, 128))
    b_pad = _round_up(b_pad, tb)

    # k-row tile: multiple of 8, sized to the per-generation pair budget.
    n_pad = _round_up(max(n, 1), 8)
    tk = (pair_budget // (4 * n_pad * tb)) // 8 * 8
    tk = max(8, min(n_pad, tk))
    n_pad = _round_up(n_pad, tk)
    # TODO(synk): for extremely large N (where even tk=8 exceeds the budget) add
    # a third grid axis over l-blocks with band skipping; typical N is small.
    return tb, tk, b_pad, n_pad, vmem_limit


def margin_loss(score, margin):
    """Pallas-backed equivalent of MarginLoss(margin)(score). Returns a scalar."""
    score = jnp.asarray(score, dtype=jnp.float32)
    b, n = score.shape

    tb, tk, b_pad, n_pad, vmem_limit = _choose_tiles(b, n)
    num_b = b_pad // tb
    num_k = n_pad // tk

    # Lane-dense layout: batch on lanes -> transpose once in the wrapper.
    score_t = jnp.zeros((n_pad, b_pad), jnp.float32).at[:n, :b].set(score.T)

    # Hoisted O(N^2) constants, built exactly once (incl. the 1/denom divide):
    k_idx = lax.broadcasted_iota(jnp.int32, (n_pad, n_pad), 0)
    l_idx = lax.broadcasted_iota(jnp.int32, (n_pad, n_pad), 1)
    shift = l_idx - k_idx
    shift_f = shift.astype(jnp.float32)
    valid = (shift >= 1) & (shift <= n - 2) & (l_idx < n) & (k_idx < n)
    bias = jnp.where(valid, jnp.float32(margin) * shift_f, -jnp.inf)
    weight = jnp.where(
        valid, 1.0 / (jnp.float32(b) * (jnp.float32(n) - shift_f)), 0.0)

    kernel = functools.partial(_margin_loss_kernel, b_true=b, tb=tb)

    partials = pl.pallas_call(
        kernel,
        out_shape=jax.ShapeDtypeStruct((num_b * num_k, 1, 1), jnp.float32),
        grid=(num_b, num_k),
        in_specs=[
            # All "neg" rows, resident across the inner k loop for each batch tile.
            pl.BlockSpec((n_pad, tb), lambda bi, ki: (0, bi)),
            # This tile's "pos" rows.
            pl.BlockSpec((tk, tb), lambda bi, ki: (ki, bi)),
            # Precomputed bias / weight bands (k-block rows, all l columns).
            pl.BlockSpec((tk, n_pad), lambda bi, ki: (ki, 0)),
            pl.BlockSpec((tk, n_pad), lambda bi, ki: (ki, 0)),
        ],
        out_specs=pl.BlockSpec((1, 1, 1), lambda bi, ki: (bi * num_k + ki, 0, 0)),
        compiler_params=pltpu.CompilerParams(
            dimension_semantics=("parallel", "arbitrary"),
            vmem_limit_bytes=vmem_limit,
        ),
        cost_estimate=pl.CostEstimate(
            flops=5 * b_pad * n_pad * n_pad,
            transcendentals=0,
            bytes_accessed=(2 * n_pad * b_pad + 2 * n_pad * n_pad) * 4
                           + num_b * num_k * 4,
        ),
    )(score_t, score_t, bias, weight)

    return jnp.sum(partials)


# --------------------------------------------------------------------------- #
# Reference + self-test
# --------------------------------------------------------------------------- #
def _margin_loss_ref(score, margin):
    """Pure-JAX reference mirroring the PyTorch module exactly."""
    score = jnp.asarray(score, dtype=jnp.float32)
    b, n = score.shape
    total = jnp.float32(0.0)
    for i in range(1, n - 1):
        pos = score[:, : n - i].reshape(-1)
        neg = score[:, i:].reshape(-1)
        total = total + jnp.mean(jnp.maximum(neg - pos + margin * i, 0.0))
    return total


if __name__ == "__main__":
    # Small shapes consistent with the module: score of shape (batch, num_scores).
    B, N = 2, 8
    margin = 0.5

    key = jax.random.PRNGKey(0)
    score = jax.random.normal(key, (B, N), dtype=jnp.float32)

    out = jax.block_until_ready(margin_loss(score, margin))
    ref = jax.block_until_ready(_margin_loss_ref(score, margin))
    assert jnp.allclose(out, ref, rtol=1e-5, atol=1e-5), (out, ref)

    print("KERNEL_OK")
</pallas_src>

<mosaic_0001>
module attributes {stable_mosaic.version = 11 : i64} {
  func.func @_margin_loss_kernel(%arg0: i32, %arg1: i32, %arg2: memref<8x128xf32, #tpu.memory_space<vmem>>, %arg3: memref<8x128xf32, #tpu.memory_space<vmem>>, %arg4: memref<8x8xf32, #tpu.memory_space<vmem>>, %arg5: memref<8x8xf32, #tpu.memory_space<vmem>>, %arg6: memref<1x1x1xf32, #tpu.memory_space<vmem>>) attributes {dimension_semantics = [#tpu.dimension_semantics<parallel>, #tpu.dimension_semantics<arbitrary>], iteration_bounds = array<i64: 1, 1>, scalar_prefetch = 0 : i64, scratch_operands = 0 : i64, tpu.core_type = #tpu.core_type<tc>, window_params = [{transform_indices = @transform_0, window_bounds = array<i64: 8, 128>}, {transform_indices = @transform_1, window_bounds = array<i64: 8, 128>}, {transform_indices = @transform_2, window_bounds = array<i64: 8, 8>}, {transform_indices = @transform_3, window_bounds = array<i64: 8, 8>}, {transform_indices = @transform_4, window_bounds = array<i64: 1, 1, 1>}]} {
    %c0 = arith.constant 0 : index
    %c0_0 = arith.constant 0 : index
    %0 = vector.load %arg2[%c0, %c0_0] : memref<8x128xf32, #tpu.memory_space<vmem>>, vector<8x128xf32>
    %c0_1 = arith.constant 0 : index
    %c0_2 = arith.constant 0 : index
    %1 = vector.load %arg3[%c0_1, %c0_2] : memref<8x128xf32, #tpu.memory_space<vmem>>, vector<8x128xf32>
    %2 = vector.shape_cast %1 : vector<8x128xf32> to vector<8x1x128xf32>
    %c0_3 = arith.constant 0 : index
    %c0_4 = arith.constant 0 : index
    %3 = vector.load %arg4[%c0_3, %c0_4] : memref<8x8xf32, #tpu.memory_space<vmem>>, vector<8x8xf32>
    %4 = vector.shape_cast %3 : vector<8x8xf32> to vector<8x8x1xf32>
    %c0_5 = arith.constant 0 : index
    %c0_6 = arith.constant 0 : index
    %5 = vector.load %arg5[%c0_5, %c0_6] : memref<8x8xf32, #tpu.memory_space<vmem>>, vector<8x8xf32>
    %6 = vector.shape_cast %5 : vector<8x8xf32> to vector<8x8x1xf32>
    %7 = vector.shape_cast %0 : vector<8x128xf32> to vector<1x8x128xf32>
    %8 = vector.broadcast %7 : vector<1x8x128xf32> to vector<8x8x128xf32>
    %9 = vector.broadcast %2 : vector<8x1x128xf32> to vector<8x8x128xf32>
    %10 = arith.subf %8, %9 : vector<8x8x128xf32>
    %11 = vector.broadcast %4 : vector<8x8x1xf32> to vector<8x8x128xf32>
    %12 = arith.addf %10, %11 : vector<8x8x128xf32>
    %cst = arith.constant 0.000000e+00 : f32
    %13 = vector.broadcast %cst : f32 to vector<8x8x128xf32>
    %14 = arith.maximumf %12, %13 : vector<8x8x128xf32>
    %15 = vector.broadcast %6 : vector<8x8x1xf32> to vector<8x8x128xf32>
    %16 = arith.mulf %14, %15 : vector<8x8x128xf32>
    %cst_7 = arith.constant dense<0.000000e+00> : vector<8x128xf32>
    %17 = vector.multi_reduction <add>, %16, %cst_7 [0] : vector<8x8x128xf32> to vector<8x128xf32>
    %cst_8 = arith.constant dense<0.000000e+00> : vector<128xf32>
    %18 = vector.multi_reduction <add>, %17, %cst_8 [0] : vector<8x128xf32> to vector<128xf32>
    %19 = vector.shape_cast %18 : vector<128xf32> to vector<1x128xf32>
    %c128_i32 = arith.constant 128 : i32
    %20 = arith.muli %arg0, %c128_i32 : i32
    %21 = tpu.iota {dimensions = array<i32: 1>} : vector<1x128xi32>
    %22 = vector.broadcast %20 : i32 to vector<1x128xi32>
    %23 = arith.addi %22, %21 : vector<1x128xi32>
    %c2_i32 = arith.constant 2 : i32
    %24 = vector.broadcast %c2_i32 : i32 to vector<1x128xi32>
    %25 = arith.cmpi slt, %23, %24 : vector<1x128xi32>
    %cst_9 = arith.constant 0.000000e+00 : f32
    %26 = vector.broadcast %cst_9 : f32 to vector<1x128xf32>
    %27 = arith.select %25, %19, %26 : vector<1x128xi1>, vector<1x128xf32>
    %28 = vector.shape_cast %27 : vector<1x128xf32> to vector<1x1x128xf32>
    %cst_10 = arith.constant dense<0.000000e+00> : vector<1xf32>
    %29 = vector.multi_reduction <add>, %28, %cst_10 [1, 2] : vector<1x1x128xf32> to vector<1xf32>
    %30 = vector.shape_cast %29 : vector<1xf32> to vector<1x1x1xf32>
    %31 = vector.extract %30[0, 0, 0] : f32 from vector<1x1x1xf32>
    %32 = vector.broadcast %31 : f32 to vector<1x1x1xf32>
    %c0_11 = arith.constant 0 : index
    %c0_12 = arith.constant 0 : index
    %c0_13 = arith.constant 0 : index
    %33 = vector.load %arg6[%c0_11, %c0_12, %c0_13] : memref<1x1x1xf32, #tpu.memory_space<vmem>>, vector<1x1x1xf32>
    tpu.vector_store %arg6[%c0_11, %c0_12, %c0_13], %32 {strides = array<i32>} : memref<1x1x1xf32, #tpu.memory_space<vmem>>, vector<1x1x1xf32>,
    return
  }
  func.func @transform_0(%arg0: i32, %arg1: i32) -> (i32, i32) {
    %c0_i32 = arith.constant 0 : i32
    %c0_i32_0 = arith.constant 0 : i32
    return %c0_i32, %arg0 : i32, i32
  }
  func.func @transform_1(%arg0: i32, %arg1: i32) -> (i32, i32) {
    %c0_i32 = arith.constant 0 : i32
    return %arg1, %arg0 : i32, i32
  }
  func.func @transform_2(%arg0: i32, %arg1: i32) -> (i32, i32) {
    %c0_i32 = arith.constant 0 : i32
    %c0_i32_0 = arith.constant 0 : i32
    return %arg1, %c0_i32 : i32, i32
  }
  func.func @transform_3(%arg0: i32, %arg1: i32) -> (i32, i32) {
    %c0_i32 = arith.constant 0 : i32
    %c0_i32_0 = arith.constant 0 : i32
    return %arg1, %c0_i32 : i32, i32
  }
  func.func @transform_4(%arg0: i32, %arg1: i32) -> (i32, i32, i32) {
    %c1_i32 = arith.constant 1 : i32
    %0 = arith.muli %arg0, %c1_i32 : i32
    %1 = arith.addi %0, %arg1 : i32
    %c0_i32 = arith.constant 0 : i32
    %c0_i32_0 = arith.constant 0 : i32
    %c0_i32_1 = arith.constant 0 : i32
    return %1, %c0_i32, %c0_i32_0 : i32, i32, i32
  }
}

</mosaic_0001>

<bundles_post_ra>
// kernel: tpu_custom_call.1
= control target key start
LH: loop header
LB: loop body
LE: loop exit
PB: predicated region body
PF: predicated region fallthrough
CT: control target
= control target key end

     0   :  { %9 = vsyncpa [#allocation3], 0  ;;  %s552_s0 = inlined_call_operand.hbm [shape: f32[8,128], index: 0, kind: input, shape index: {}]   ;;  %s553_s1 = inlined_call_operand.hbm [shape: f32[8,128], index: 1, kind: input, shape index: {}]   ;;  %s554_s2 = inlined_call_operand.hbm [shape: f32[8,8], index: 2, kind: input, shape index: {}]   ;;  %s555_s3 = inlined_call_operand.hbm [shape: f32[8,8], index: 3, kind: input, shape index: {}]   ;;  %s556_s4 = inlined_call_operand.hbm [shape: f32[1,1,1], index: 4, kind: output, shape index: {}]  }
   0x1   :  { %10 = vsyncpa [#allocation6], 0 }
   0x2   :  { %11 = vsyncpa [#allocation9], 0 }
   0x3   :  { %12 = vsyncpa [#allocation4], 0  ;;  %s475_s15 = smov [#allocation5]   ;;  %s476_s17 = smov [#allocation2]  }
   0x4   :  { %s29_s16 = sshll.u32 %s475_s15, 4  ;;  %s19_s18 = sshll.u32 %s476_s17, 4  ;;  %s30_s16 = int_to_ptr.vmem [resolvable:$true] %s29_s16  ;;  %s20_s18 = int_to_ptr.vmem [resolvable:$true] %s19_s18 }
   0x5   :  { %s375_s19 = scalar_lea.vmem %s30_s16, 128  ;;  %p380_p1 = scmp.lt.s32.totalorder %s30_s16, %s30_s16 }
   0x6   :  { %p376_p0 = scmp.ne.s32.totalorder %s30_s16, %s375_s19  ;;  %p381_p2 = scmp.lt.s32.totalorder %s375_s19, %s375_s19 }
   0x8   :  { %p382_p3 = por %p381_p2, %p380_p1 }
   0xa   :  { %p383_p4 = pnand %p382_p3, %p376_p0 }
   0xc   :  { %386 = shalt.err (!%p383_p4)
}
   0xd   :  { %32 = dma.hbm_to_vmem [thread:$0]  %s553_s1, 128, %s30_s16, [#allocation6]  }
   0xe   :  { %s395_s22 = scalar_lea.vmem %s20_s18, 128  ;;  %p400_p6 = scmp.lt.s32.totalorder %s20_s18, %s20_s18 }
   0xf   :  { %p396_p5 = scmp.ne.s32.totalorder %s20_s18, %s395_s22  ;;  %p401_p7 = scmp.lt.s32.totalorder %s395_s22, %s395_s22 }
  0x11   :  { %p402_p8 = por %p401_p7, %p400_p6 }
  0x13   :  { %p403_p9 = pnand %p402_p8, %p396_p5 }
  0x15   :  { %406 = shalt.err (!%p403_p9)
}
  0x16   :  { %22 = dma.hbm_to_vmem [thread:$0]  %s552_s0, 128, %s20_s18, [#allocation3]  }
  0x17   :  { %s477_s25 = smov [#allocation7]   ;;  %s478_s27 = smov [#allocation8]  }
  0x18   :  { %s39_s26 = sshll.u32 %s477_s25, 4  ;;  %s49_s28 = sshll.u32 %s478_s27, 4  ;;  %s40_s26 = int_to_ptr.vmem [resolvable:$true] %s39_s26  ;;  %s50_s28 = int_to_ptr.vmem [resolvable:$true] %s49_s28 }
  0x19   :  { %s415_s29 = scalar_lea.vmem %s40_s26, 128  ;;  %p420_p11 = scmp.lt.s32.totalorder %s40_s26, %s40_s26 }
  0x1a   :  { %p416_p10 = scmp.ne.s32.totalorder %s40_s26, %s415_s29  ;;  %p421_p12 = scmp.lt.s32.totalorder %s415_s29, %s415_s29 }
  0x1c   :  { %p422_p13 = por %p421_p12, %p420_p11 }
  0x1e   :  { %p423_p0 = pnand %p422_p13, %p416_p10 }
  0x20   :  { %426 = shalt.err (!%p423_p0)
}
  0x21   :  { %42 = dma.hbm_to_vmem [thread:$0]  %s554_s2, 128, %s40_s26, [#allocation6]  }
  0x22   :  { %s435_s5 = scalar_lea.vmem %s50_s28, 128  ;;  %p440_p2 = scmp.lt.s32.totalorder %s50_s28, %s50_s28 }
  0x23   :  { %p436_p1 = scmp.ne.s32.totalorder %s50_s28, %s435_s5  ;;  %p441_p3 = scmp.lt.s32.totalorder %s435_s5, %s435_s5 }
  0x25   :  { %p442_p4 = por %p441_p3, %p440_p2 }
  0x27   :  { %p443_p5 = pnand %p442_p4, %p436_p1 }
  0x29   :  { %446 = shalt.err (!%p443_p5)
}
  0x2a   :  { %52 = dma.hbm_to_vmem [thread:$0]  %s555_s3, 128, %s50_s28, [#allocation9]  }
  0x2b   :  { %467 = dma.done.wait [#allocation3], 128  }
  0x2c   :  { %468 = vsyncadd [#allocation3], 4294967168 }
  0x2d   :  { %469 = dma.done.wait [#allocation6], 256  }
  0x2e   :  { %470 = vsyncadd [#allocation6], 4294967040 }
  0x2f   :  { %471 = dma.done.wait [#allocation9], 128  }
  0x30   :  { %472 = vsyncadd [#allocation9], 4294967168  ;;  %v73_v0 = vlaneseq  ;;  %v479_v1 = vmov 1966171168   ;;  %v118_v9 = vld [vmem:[#allocation7] sm:$0xff]  ;;  %v67_v13 = vld [vmem:[#allocation5] sm:$0xff] }
  0x31   :  { %v71_v2 = vunpack.c.l.s4 %v479_v1  ;;  %v175_v16 = vld [vmem:[#allocation8] sm:$0xff]  ;;  %v69_v18 = vcombine.high %v67_v13, %v67_v13  ;;  %v66_v54 = vld [vmem:[#allocation2] sm:$0xff]  ;;  %vm324_vm1 = vcmask 1040384   ;;  %s480_s2 = smov [#allocation10]   ;;  %vm336_vm2 = vcmask 0  }
  0x32   :  { %v519_v3 = vshrl.u32 %v73_v0, 7  ;;  %s347_s3 = sshll.u32 %s480_s2, 4  ;;  %s348_s3 = int_to_ptr.vmem [resolvable:$true] %s347_s3 }
  0x33   :  { %v72_v6 = vunpack.c.0.s8 %v71_v2  ;;  %s447_s8 = scalar_lea.vmem %s348_s3, 16  ;;  %s451_s9 = scalar_lea.vmem %s348_s3, 32 }
  0x34   :  { %v135_v4 = vsub.s32 2, %v519_v3  ;;  %v523_v5 = vsub.s32 0, %v519_v3  ;;  %v142_v7 = vsub.s32 3, %v519_v3  ;;  %v128_v8 = vsub.s32 1, %v519_v3  ;;  %p448_p6 = scmp.ne.s32.totalorder %s348_s3, %s447_s8  ;;  %p452_p7 = scmp.lt.s32.totalorder %s348_s3, %s348_s3 }
  0x35   :  { %v75_v12 = vsub.s32 %v72_v6, %v519_v3  ;;  %v149_v21 = vsub.s32 4, %v519_v3  ;;  %v156_v32 = vsub.s32 5, %v519_v3  ;;  %v163_v44 = vsub.s32 6, %v519_v3  ;;  %p453_p8 = scmp.lt.s32.totalorder %s451_s9, %s447_s8 }
  0x36   :  { %v136_v10 = vrot.slane %v118_v9, %v135_v4  ;;  %v122_v11 = vrot.slane %v118_v9, %v523_v5  ;;  %v143_v14 = vrot.slane %v118_v9, %v142_v7  ;;  %v129_v15 = vrot.slane %v118_v9, %v128_v8 }
  0x37   :  { %v76_v17 = vrot.slane %v67_v13, %v75_v12  ;;  %v186_v19 = vrot.slane %v175_v16, %v128_v8  ;;  %v179_v20 = vrot.slane %v175_v16, %v523_v5  ;;  %v83_v24 = vrot.slane %v69_v18, %v75_v12  ;;  %p454_p9 = por %p453_p8, %p452_p7 }
  0x38   :  { %138 = vbcast.lane.b32.xlu1 %v136_v10, 256  ;;  %124 = vbcast.lane.b32.xlu0 %v122_v11, 256  ;;  %v193_v29 = vrot.slane %v175_v16, %v135_v4  ;;  %v150_v31 = vrot.slane %v118_v9, %v149_v21  ;;  %v200_v42 = vrot.slane %v175_v16, %v142_v7  ;;  %v170_v49 = vsub.s32 7, %v519_v3 }
  0x39   :  { %v92_v22 = vrot.slane %v76_v17, %v75_v12  ;;  %v84_v23 = vcombine.high %v76_v17, %v76_v17  ;;  %v99_v28 = vrot.slane %v83_v24, %v75_v12  ;;  %v85_v30 = vcombine.high %v83_v24, %v83_v24  ;;  %p455_p10 = pnand %p454_p9, %p448_p6 }
  0x3a   :  { %v157_v43 = vrot.slane %v118_v9, %v156_v32  ;;  %v207_v47 = vrot.slane %v175_v16, %v149_v21  ;;  %v164_v48 = vrot.slane %v118_v9, %v163_v44  ;;  %v214_v50 = vrot.slane %v175_v16, %v156_v32 }
  0x3b   :  { %v114_v25 = vcombine.high %v92_v22, %v92_v22  ;;  %v235_v26 = vrot.slane %v92_v22, %v523_v5  ;;  %v106_v27 = vrot.slane %v84_v23, %v75_v12  ;;  %v251_v36 = vrot.slane %v99_v28, %v523_v5 }
  0x3c   :  { %145 = vbcast.lane.b32.xlu1 %v143_v14, 256  ;;  %131 = vbcast.lane.b32.xlu0 %v129_v15, 256  ;;  %v113_v37 = vrot.slane %v85_v30, %v75_v12  ;;  %v115_v38 = vcombine.high %v99_v28, %v99_v28  ;;  %v171_v51 = vrot.slane %v118_v9, %v170_v49 }
  0x3d   :  { %v243_v33 = vrot.slane %v114_v25, %v523_v5  ;;  %v116_v34 = vcombine.high %v106_v27, %v106_v27  ;;  %v239_v35 = vrot.slane %v106_v27, %v523_v5  ;;  %v228_v52 = vrot.slane %v175_v16, %v170_v49 }
  0x3e   :  { %v255_v40 = vrot.slane %v113_v37, %v523_v5  ;;  %v539_v41 = vrot.slane %v115_v38, %v523_v5  ;;  %v117_v45 = vcombine.high %v113_v37, %v113_v37  ;;  %v221_v53 = vrot.slane %v175_v16, %v163_v44 }
  0x3f   :  { %v247_v39 = vrot.slane %v116_v34, %v523_v5  ;;  %v272_v55 = vsub.f32 %v66_v54, %v235_v26  ;;  %v273_v58 = vsub.f32 %v66_v54, %v239_v35  ;;  %v274_v59 = vsub.f32 %v66_v54, %v243_v33 }
  0x40   :  { %188 = vbcast.lane.b32.xlu1 %v186_v19, 256  ;;  %181 = vbcast.lane.b32.xlu0 %v179_v20, 256  ;;  %v543_v46 = vrot.slane %v117_v45, %v523_v5  ;;  %v276_v12 = vsub.f32 %v66_v54, %v251_v36  ;;  %v277_v19 = vsub.f32 %v66_v54, %v255_v40 }
  0x41   :  { %v275_v3 = vsub.f32 %v66_v54, %v247_v39  ;;  %v278_v26 = vsub.f32 %v66_v54, %v539_v41 }
  0x42   :  { %v279_v30 = vsub.f32 %v66_v54, %v543_v46  ;;  %v319_v46 = vand.u32 127, %v73_v0 }
  0x44   :  { %195 = vbcast.lane.b32.xlu1 %v193_v29, 256  ;;  %152 = vbcast.lane.b32.xlu0 %v150_v31, 256  ;;  %vm322_vm0 = vcmp.lt.s32.totalorder %v319_v46, 2 }
  0x48   :  { %202 = vbcast.lane.b32.xlu1 %v200_v42, 256  ;;  %159 = vbcast.lane.b32.xlu0 %v157_v43, 256 }
  0x4c   :  { %209 = vbcast.lane.b32.xlu1 %v207_v47, 256  ;;  %166 = vbcast.lane.b32.xlu0 %v164_v48, 256 }
  0x50   :  { %216 = vbcast.lane.b32.xlu1 %v214_v50, 256  ;;  %173 = vbcast.lane.b32.xlu0 %v171_v51, 256 }
  0x54   :  { %230 = vbcast.lane.b32.xlu1 %v228_v52, 256  ;;  %223 = vbcast.lane.b32.xlu0 %v221_v53, 256 }
  0xaa   :  { %v139_v56 = vpop.permute.xlu1 %138  ;;  %v125_v57 = vpop.permute.xlu0 %124 }
  0xab   :  { %v280_v60 = vadd.f32 %v272_v55, %v125_v57  ;;  %v282_v1 = vadd.f32 %v274_v59, %v139_v56 }
  0xad   :  { %v288_v2 = vmax.f32 %v280_v60, 0.0  ;;  %v290_v9 = vmax.f32 %v282_v1, 0.0 }
  0xae   :  { %v146_v61 = vpop.permute.xlu1 %145  ;;  %v132_v62 = vpop.permute.xlu0 %131 }
  0xaf   :  { %v281_v63 = vadd.f32 %v273_v58, %v132_v62  ;;  %v283_v10 = vadd.f32 %v275_v3, %v146_v61 }
  0xb1   :  { %v289_v4 = vmax.f32 %v281_v63, 0.0  ;;  %v291_v16 = vmax.f32 %v283_v10, 0.0 }
  0xb2   :  { %v189_v5 = vpop.permute.xlu1 %188  ;;  %v182_v6 = vpop.permute.xlu0 %181 }
  0xb3   :  { %v297_v7 = vmul.f32 %v289_v4, %v189_v5  ;;  %v296_v8 = vmul.f32 %v288_v2, %v182_v6 }
  0xb5   :  { %v304_v11 = vadd.f32 %v297_v7, %v296_v8 }
  0xb6   :  { %v196_v13 = vpop.permute.xlu1 %195  ;;  %v153_v14 = vpop.permute.xlu0 %152 }
  0xb7   :  { %v298_v15 = vmul.f32 %v290_v9, %v196_v13  ;;  %v284_v18 = vadd.f32 %v276_v12, %v153_v14 }
  0xb9   :  { %v305_v17 = vadd.f32 %v304_v11, %v298_v15  ;;  %v292_v23 = vmax.f32 %v284_v18, 0.0 }
  0xba   :  { %v203_v20 = vpop.permute.xlu1 %202  ;;  %v160_v21 = vpop.permute.xlu0 %159 }
  0xbb   :  { %v299_v22 = vmul.f32 %v291_v16, %v203_v20  ;;  %v285_v25 = vadd.f32 %v277_v19, %v160_v21 }
  0xbd   :  { %v306_v24 = vadd.f32 %v305_v17, %v299_v22  ;;  %v293_v31 = vmax.f32 %v285_v25, 0.0 }
  0xbe   :  { %v210_v27 = vpop.permute.xlu1 %209  ;;  %v167_v28 = vpop.permute.xlu0 %166 }
  0xbf   :  { %v300_v29 = vmul.f32 %v292_v23, %v210_v27  ;;  %v286_v33 = vadd.f32 %v278_v26, %v167_v28 }
  0xc1   :  { %v307_v32 = vadd.f32 %v306_v24, %v300_v29  ;;  %v294_v38 = vmax.f32 %v286_v33, 0.0 }
  0xc2   :  { %v217_v34 = vpop.permute.xlu1 %216  ;;  %v174_v35 = vpop.permute.xlu0 %173 }
  0xc3   :  { %v301_v36 = vmul.f32 %v293_v31, %v217_v34  ;;  %v287_v37 = vadd.f32 %v279_v30, %v174_v35 }
  0xc5   :  { %v308_v39 = vadd.f32 %v307_v32, %v301_v36  ;;  %v295_v40 = vmax.f32 %v287_v37, 0.0 }
  0xc6   :  { %v231_v42 = vpop.permute.xlu1 %230  ;;  %v224_v43 = vpop.permute.xlu0 %223 }
  0xc7   :  { %v302_v44 = vmul.f32 %v294_v38, %v224_v43  ;;  %v303_v45 = vmul.f32 %v295_v40, %v231_v42 }
  0xc9   :  { %v309_v41 = vadd.f32 %v308_v39, %v302_v44 }
  0xcb   :  { %v310_v47 = vadd.f32 %v309_v41, %v303_v45 }
  0xcd   :  { %v311_v48 = vrot.slane %v310_v47, 4 }
  0xcf   :  { %v312_v49 = vadd.f32 %v311_v48, %v310_v47 }
  0xd1   :  { %v313_v50 = vrot.slane %v312_v49, 2 }
  0xd3   :  { %v314_v51 = vadd.f32 %v313_v50, %v312_v49 }
  0xd5   :  { %v315_v52 = vrot.slane %v314_v51, 1 }
  0xd7   :  { %v316_v53 = vadd.f32 %v315_v52, %v314_v51 }
  0xd9   :  { %v323_v54 = vsel %vm322_vm0, %v316_v53, 0.0 }
  0xda   :  { %v325_v55 = vsel %vm324_vm1, %v323_v54, 0.0 }
  0xdb   :  { %326 = vadd.xlane.f32.xlu0 %v325_v55 }
 0x164   :  { %v327_v56 = vpop.xlane.xlu0 %326 }
 0x165   :  { %v328_v57 = vrot.slane %v327_v56, 4 }
 0x167   :  { %v329_v58 = vadd.f32 %v328_v57, %v327_v56 }
 0x169   :  { %v330_v59 = vrot.slane %v329_v58, 2 }
 0x16b   :  { %v331_v60 = vadd.f32 %v330_v59, %v329_v58 }
 0x16d   :  { %v332_v61 = vrot.slane %v331_v60, 1 }
 0x16f   :  { %v333_v62 = vadd.f32 %v332_v61, %v331_v60 }
 0x171   :  { %358 = vpush %v333_v62 }
 0x1a2   :  { %s359_s7 = spop %358 }
 0x1a3   :  { %v335_v0 = vstv %s359_s7 }
 0x1a4   :  { %337 = vst.msk [vmem:[#allocation10] sm:$0x1] %vm336_vm2, %v335_v0 }
 0x1a5   :  { %458 = shalt.err (!%p455_p10)
}
 0x1a6   :  { %350 = dma.vmem_to_hbm [thread:$0]  %s348_s3, 16, %s556_s4, [#allocation4]  }
 0x1a7   :  { %473 = dma.done.wait [#allocation4], 16  }
 0x1a8   :  { %474 = vsyncadd [#allocation4], 4294967280 }
 0x1a9   :  { %354 = vsyncpa [#allocation3], 1 }
 0x1aa   :  { %355 = vsyncpa [#allocation6], 1 }
 0x1ab   :  { %356 = vsyncpa [#allocation9], 1 }
 0x1ac   :  { %357 = vsyncpa [#allocation4], 1 }

</bundles_post_ra>
